<compile_context>
chip_gen: v7x
topology: tpu7x:2x2x1
jax: 0.10.0
libtpu: 0.0.40
codegen_flags: <defaults>
</compile_context>

<pallas_src>
import functools
import math

import jax
import jax.numpy as jnp
from jax.experimental import pallas as pl
from jax.experimental.pallas import tpu as pltpu


def layer_norm_kernel_packed(x_ref, avg_ref, gamma_ref, beta_ref, o_ref, *, epsilon):
    """Lane-packed tile: [br, W] rows, each W lanes = `pack` logical rows of D.

    avg_ref is a (W, W) block-diagonal matrix with 1/D inside each DxD block,
    so x @ avg broadcasts each D-lane segment's mean across that segment.
    """
    x = x_ref[...].astype(jnp.float32)                      # [br, W]
    avg = avg_ref[...]                                      # [W, W] fp32

    mean_b = jnp.dot(x, avg,
                     preferred_element_type=jnp.float32,
                     precision=jax.lax.Precision.HIGHEST)   # [br, W] segment means
    centered = x - mean_b
    var_b = jnp.dot(centered * centered, avg,
                    preferred_element_type=jnp.float32,
                    precision=jax.lax.Precision.HIGHEST)    # unbiased=False variance
    std = jnp.sqrt(var_b)
    inv = 1.0 / (std + epsilon)   # exact; eps added to std (PyTorch semantics)
    y = centered * inv
    o_ref[...] = (gamma_ref[...] * y + beta_ref[...]).astype(o_ref.dtype)


def layer_norm_kernel_simple(x_ref, gamma_ref, beta_ref, o_ref, *, epsilon):
    """Fallback (no lane packing): normalize each row over its last dim."""
    x = x_ref[...].astype(jnp.float32)
    mean = jnp.mean(x, axis=-1, keepdims=True)
    centered = x - mean
    var = jnp.mean(centered * centered, axis=-1, keepdims=True)
    inv = 1.0 / (jnp.sqrt(var) + epsilon)
    o_ref[...] = (gamma_ref[...] * (centered * inv) + beta_ref[...]).astype(o_ref.dtype)


def layer_norm(x, gamma, beta, epsilon=1e-10, block_rows=8192):
    orig_shape = x.shape
    D = orig_shape[-1]
    R = int(math.prod(orig_shape[:-1])) if len(orig_shape) > 1 else 1
    out_dtype = x.dtype

    # ---- lane packing: pack `pack` logical rows into one 128-lane row ----
    pack = 1
    if D <= 128 and 128 % D == 0:
        pack = 128 // D
        while pack > 1 and R % pack != 0:
            pack //= 2
    W = D * pack
    Rp = R // pack
    x2 = x.reshape(Rp, W)  # contiguous => free

    gamma_w = jnp.tile(gamma.astype(jnp.float32).reshape(1, D), (1, pack))
    beta_w = jnp.tile(beta.astype(jnp.float32).reshape(1, D), (1, pack))

    # ---- row-tile selection (no host-side pad; last block may be partial) ----
    if Rp <= 8:
        br = Rp                              # single full block (full-dim allowed)
    else:
        br = min(block_rows, Rp)
        if br >= Rp:
            br = pl.cdiv(Rp, 2)              # >= 2 grid steps: feeds both v7x TCs
        br = max(8, ((br + 7) // 8) * 8)     # multiple of 8 sublanes
    grid = (pl.cdiv(Rp, br),)

    x_spec = pl.BlockSpec((br, W), lambda i: (i, 0))
    gb_spec = pl.BlockSpec((1, W), lambda i: (0, 0))
    out_spec = pl.BlockSpec((br, W), lambda i: (i, 0))

    compiler_params = pltpu.CompilerParams(
        dimension_semantics=("parallel",),
        vmem_limit_bytes=48 * 1024 * 1024,   # in+out double-buffered 4 MiB tiles fit easily
    )

    if pack > 1:
        # (W, W) block-diagonal averaging matrix: 1/D within each D-lane segment.
        seg = jnp.arange(W) // D
        avg = jnp.where(seg[:, None] == seg[None, :], 1.0 / D, 0.0).astype(jnp.float32)
        out = pl.pallas_call(
            functools.partial(layer_norm_kernel_packed, epsilon=epsilon),
            out_shape=jax.ShapeDtypeStruct((Rp, W), out_dtype),
            grid_spec=pltpu.PrefetchScalarGridSpec(
                num_scalar_prefetch=0,
                grid=grid,
                in_specs=[x_spec,
                          pl.BlockSpec((W, W), lambda i: (0, 0)),
                          gb_spec, gb_spec],
                out_specs=out_spec,
            ),
            compiler_params=compiler_params,
        )(x2, avg, gamma_w, beta_w)
    else:
        out = pl.pallas_call(
            functools.partial(layer_norm_kernel_simple, epsilon=epsilon),
            out_shape=jax.ShapeDtypeStruct((Rp, W), out_dtype),
            grid_spec=pltpu.PrefetchScalarGridSpec(
                num_scalar_prefetch=0,
                grid=grid,
                in_specs=[x_spec, gb_spec, gb_spec],
                out_specs=out_spec,
            ),
            compiler_params=compiler_params,
        )(x2, gamma_w, beta_w)

    return out.reshape(orig_shape)


def reference(x, gamma, beta, epsilon=1e-10):
    """Pure-JAX mirror of the PyTorch forward."""
    mean = jnp.mean(x, axis=-1, keepdims=True)
    std = jnp.sqrt(jnp.mean((x - mean) ** 2, axis=-1, keepdims=True))
    x_norm = (x - mean) / (std + epsilon)
    return gamma * x_norm + beta


if __name__ == "__main__":
    # small shapes: batch N=2, seq K=8, emb_dim D=32
    N, K, D = 2, 8, 32

    root = jax.random.PRNGKey(0)
    kx, kg, kb = jax.random.split(root, 3)

    x = jax.random.normal(kx, (N, K, D), jnp.float32)
    gamma = 1.0 + 0.1 * jax.random.normal(kg, (D,), jnp.float32)
    beta = 0.1 * jax.random.normal(kb, (D,), jnp.float32)

    out = layer_norm(x, gamma, beta, epsilon=1e-10)
    out = jax.block_until_ready(out)

    ref = reference(x, gamma, beta, epsilon=1e-10)
    assert out.shape == (N, K, D)
    assert out.dtype == x.dtype
    assert jnp.allclose(out, ref, atol=1e-5, rtol=1e-5), "mismatch vs pure-JAX reference"

    print("KERNEL_OK")
</pallas_src>

<mosaic_0001>
module attributes {stable_mosaic.version = 11 : i64} {
  func.func @layer_norm_kernel_packed(%arg0: i32, %arg1: memref<4x128xf32, #tpu.memory_space<vmem>>, %arg2: memref<128x128xf32, #tpu.memory_space<vmem>>, %arg3: memref<1x128xf32, #tpu.memory_space<vmem>>, %arg4: memref<1x128xf32, #tpu.memory_space<vmem>>, %arg5: memref<4x128xf32, #tpu.memory_space<vmem>>) attributes {dimension_semantics = [#tpu.dimension_semantics<parallel>], iteration_bounds = array<i64: 1>, scalar_prefetch = 0 : i64, scratch_operands = 0 : i64, tpu.core_type = #tpu.core_type<tc>, window_params = [{transform_indices = @transform_0, window_bounds = array<i64: 4, 128>}, {pipeline_mode = #tpu.pipeline_mode<synchronous>, transform_indices = @transform_1, window_bounds = array<i64: 128, 128>}, {pipeline_mode = #tpu.pipeline_mode<synchronous>, transform_indices = @transform_2, window_bounds = array<i64: 1, 128>}, {pipeline_mode = #tpu.pipeline_mode<synchronous>, transform_indices = @transform_3, window_bounds = array<i64: 1, 128>}, {transform_indices = @transform_4, window_bounds = array<i64: 4, 128>}]} {
    %c0 = arith.constant 0 : index
    %c0_0 = arith.constant 0 : index
    %0 = vector.load %arg1[%c0, %c0_0] : memref<4x128xf32, #tpu.memory_space<vmem>>, vector<4x128xf32>
    %c0_1 = arith.constant 0 : index
    %c0_2 = arith.constant 0 : index
    %1 = vector.load %arg2[%c0_1, %c0_2] : memref<128x128xf32, #tpu.memory_space<vmem>>, vector<128x128xf32>
    %cst = arith.constant dense<0.000000e+00> : vector<4x128xf32>
    %2 = tpu.matmul %0, %1, %cst {dimension_numbers = #tpu.dot_dimension_numbers<[1], [0], [0], [1], [0, 0, 1, 1], [], []>, precision = #tpu.contract_precision<fp32>} : vector<4x128xf32>, vector<128x128xf32>, vector<4x128xf32> -> vector<4x128xf32>
    %3 = arith.subf %0, %2 : vector<4x128xf32>
    %4 = arith.mulf %3, %3 : vector<4x128xf32>
    %cst_3 = arith.constant dense<0.000000e+00> : vector<4x128xf32>
    %5 = tpu.matmul %4, %1, %cst_3 {dimension_numbers = #tpu.dot_dimension_numbers<[1], [0], [0], [1], [0, 0, 1, 1], [], []>, precision = #tpu.contract_precision<fp32>} : vector<4x128xf32>, vector<128x128xf32>, vector<4x128xf32> -> vector<4x128xf32>
    %6 = math.sqrt %5 : vector<4x128xf32>
    %cst_4 = arith.constant 1.000000e-10 : f32
    %7 = vector.broadcast %cst_4 : f32 to vector<4x128xf32>
    %8 = arith.addf %6, %7 : vector<4x128xf32>
    %cst_5 = arith.constant 1.000000e+00 : f32
    %9 = vector.broadcast %cst_5 : f32 to vector<4x128xf32>
    %10 = arith.divf %9, %8 : vector<4x128xf32>
    %11 = arith.mulf %3, %10 : vector<4x128xf32>
    %c0_6 = arith.constant 0 : index
    %c0_7 = arith.constant 0 : index
    %12 = vector.load %arg3[%c0_6, %c0_7] : memref<1x128xf32, #tpu.memory_space<vmem>>, vector<1x128xf32>
    %13 = vector.broadcast %12 : vector<1x128xf32> to vector<4x128xf32>
    %14 = arith.mulf %13, %11 : vector<4x128xf32>
    %c0_8 = arith.constant 0 : index
    %c0_9 = arith.constant 0 : index
    %15 = vector.load %arg4[%c0_8, %c0_9] : memref<1x128xf32, #tpu.memory_space<vmem>>, vector<1x128xf32>
    %16 = vector.broadcast %15 : vector<1x128xf32> to vector<4x128xf32>
    %17 = arith.addf %14, %16 : vector<4x128xf32>
    %c0_10 = arith.constant 0 : index
    %c0_11 = arith.constant 0 : index
    %18 = vector.load %arg5[%c0_10, %c0_11] : memref<4x128xf32, #tpu.memory_space<vmem>>, vector<4x128xf32>
    tpu.vector_store %arg5[%c0_10, %c0_11], %17 {strides = array<i32>} : memref<4x128xf32, #tpu.memory_space<vmem>>, vector<4x128xf32>,
    return
  }
  func.func @transform_0(%arg0: i32) -> (i32, i32) {
    %c0_i32 = arith.constant 0 : i32
    %c0_i32_0 = arith.constant 0 : i32
    return %arg0, %c0_i32 : i32, i32
  }
  func.func @transform_1(%arg0: i32) -> (i32, i32) {
    %c0_i32 = arith.constant 0 : i32
    %c0_i32_0 = arith.constant 0 : i32
    %c0_i32_1 = arith.constant 0 : i32
    return %c0_i32, %c0_i32_0 : i32, i32
  }
  func.func @transform_2(%arg0: i32) -> (i32, i32) {
    %c0_i32 = arith.constant 0 : i32
    %c0_i32_0 = arith.constant 0 : i32
    %c0_i32_1 = arith.constant 0 : i32
    return %c0_i32, %c0_i32_0 : i32, i32
  }
  func.func @transform_3(%arg0: i32) -> (i32, i32) {
    %c0_i32 = arith.constant 0 : i32
    %c0_i32_0 = arith.constant 0 : i32
    %c0_i32_1 = arith.constant 0 : i32
    return %c0_i32, %c0_i32_0 : i32, i32
  }
  func.func @transform_4(%arg0: i32) -> (i32, i32) {
    %c0_i32 = arith.constant 0 : i32
    %c0_i32_0 = arith.constant 0 : i32
    return %arg0, %c0_i32 : i32, i32
  }
}

</mosaic_0001>

<bundles_post_ra>
// kernel: tpu_custom_call.1
= control target key start
LH: loop header
LB: loop body
LE: loop exit
PB: predicated region body
PF: predicated region fallthrough
CT: control target
= control target key end

     0   :  { %9 = vsyncpa [#allocation3], 0  ;;  %s2880_s0 = inlined_call_operand.hbm [shape: f32[4,128], index: 0, kind: input, shape index: {}]   ;;  %s2881_s1 = inlined_call_operand.hbm [shape: f32[128,128], index: 1, kind: input, shape index: {}]   ;;  %s2882_s2 = inlined_call_operand.vmem [shape: f32[1,128], index: 2, kind: input, shape index: {}]   ;;  %s2883_s3 = inlined_call_operand.vmem [shape: f32[1,128], index: 3, kind: input, shape index: {}]   ;;  %s2884_s4 = inlined_call_operand.hbm [shape: f32[4,128], index: 4, kind: output, shape index: {}]  }
   0x1   :  { %10 = vsyncpa [#allocation6], 0 }
   0x2   :  { %11 = vsyncpa [#allocation4], 0  ;;  %s2407_s15 = smov [#allocation2]   ;;  %s2408_s17 = smov [#allocation5]  }
   0x3   :  { %s18_s16 = sshll.u32 %s2407_s15, 4  ;;  %s27_s18 = sshll.u32 %s2408_s17, 4  ;;  %s19_s16 = int_to_ptr.vmem [resolvable:$true] %s18_s16  ;;  %s2440_s18 = int_to_ptr.vmem [resolvable:$true] %s27_s18 }
   0x4   :  { %s2335_s21 = scalar_lea.hbm %s2880_s0, 64 }
   0x5   :  { %p2336_p0 = scmp.ne.s32.totalorder %s2880_s0, %s2335_s21  ;;  %p2339_p1 = scmp.lt.u32.totalorder %s2335_s21, %s2880_s0 }
   0x7   :  { %p2341_p2 = pnand %p2339_p1, %p2336_p0 }
   0x9   :  { %2344 = shalt.err (!%p2341_p2)
}
   0xa   :  { %s2345_s26 = scalar_lea.vmem %s19_s16, 64  ;;  %p2350_p4 = scmp.lt.s32.totalorder %s19_s16, %s19_s16 }
   0xb   :  { %p2346_p3 = scmp.ne.s32.totalorder %s19_s16, %s2345_s26  ;;  %p2351_p5 = scmp.lt.s32.totalorder %s2345_s26, %s2345_s26 }
   0xd   :  { %p2352_p6 = por %p2351_p5, %p2350_p4 }
   0xf   :  { %p2353_p7 = pnand %p2352_p6, %p2346_p3 }
  0x11   :  { %2356 = shalt.err (!%p2353_p7)
}
  0x12   :  { %21 = dma.hbm_to_vmem [thread:$0]  %s2880_s0, 64, %s19_s16, [#allocation3]  }
  0x13   :  { %s2357_s5 = scalar_lea.hbm %s2881_s1, 2048 }
  0x14   :  { %p2358_p8 = scmp.ne.s32.totalorder %s2881_s1, %s2357_s5  ;;  %p2361_p9 = scmp.lt.u32.totalorder %s2357_s5, %s2881_s1 }
  0x16   :  { %p2363_p10 = pnand %p2361_p9, %p2358_p8 }
  0x18   :  { %2366 = shalt.err (!%p2363_p10)
}
  0x19   :  { %s2367_s10 = scalar_lea.vmem %s2440_s18, 2048  ;;  %p2372_p12 = scmp.lt.s32.totalorder %s2440_s18, %s2440_s18 }
  0x1a   :  { %p2368_p11 = scmp.ne.s32.totalorder %s2440_s18, %s2367_s10  ;;  %p2373_p13 = scmp.lt.s32.totalorder %s2367_s10, %s2367_s10 }
  0x1c   :  { %p2374_p0 = por %p2373_p13, %p2372_p12 }
  0x1e   :  { %p2375_p1 = pnand %p2374_p0, %p2368_p11 }
  0x20   :  { %2378 = shalt.err (!%p2375_p1)
}
  0x21   :  { %s2409_s0 = smov 128   ;;  %s2410_s11 = smov 8  }
  0x22   :  { %33 = dma.hbm_to_vmem [thread:$0]  %s2881_s1, 2048, %s2440_s18, [#allocation6], %s2409_s0, %s2409_s0, %s2410_s11  }
  0x23   :  { %2401 = dma.done.wait [#allocation3], 64  }
  0x24   :  { %2402 = vsyncadd [#allocation3], 4294967232 }
  0x25   :  { %2403 = dma.done.wait [#allocation6], 2048  }
  0x26   :  { %2404 = vsyncadd [#allocation6], 4294965248  ;;  %v2411_v0 = vmov 0.0|0.0   ;;  %vm2412_vm0 = vmmov 0   ;;  %v2413_v1 = vmov 0.0   ;;  %v45_v2 = vld [vmem:[#allocation5] sm:$0xff] }
  0x27   :  { %2015 = vmatprep.subr.bf16.mxu0 %v2411_v0  ;;  %1627 = vmatprep.mubr.msk.f32.mxu0 %vm2412_vm0, %v2413_v1  ;;  %v46_v3 = vld [vmem:[#allocation5 + $0x8] sm:$0xff]  ;;  %v47_v4 = vld [vmem:[#allocation5 + $0x10] sm:$0xff]  ;;  %v62_v5 = vand.u32 4294901760, %v45_v2  ;;  %v48_v7 = vld [vmem:[#allocation5 + $0x18] sm:$0xff]  ;;  %s2414_s17 = smov [#allocation7]  }
  0x28   :  { %2159 = vmatprep.subr.bf16.mxu1 %v2411_v0  ;;  %1837 = vmatprep.mubr.msk.f32.mxu1 %vm2412_vm0, %v2413_v1  ;;  %v65_v6 = vand.u32 4294901760, %v46_v3  ;;  %v68_v8 = vand.u32 4294901760, %v47_v4  ;;  %v71_v9 = vand.u32 4294901760, %v48_v7  ;;  %v49_v10 = vld [vmem:[#allocation5 + $0x20] sm:$0xff]  ;;  %v50_v11 = vld [vmem:[#allocation5 + $0x28] sm:$0xff]  ;;  %v51_v16 = vld [vmem:[#allocation5 + $0x30] sm:$0xff] }
  0x29   :  { %v74_v14 = vand.u32 4294901760, %v49_v10  ;;  %v77_v15 = vand.u32 4294901760, %v50_v11  ;;  %v52_v17 = vld [vmem:[#allocation5 + $0x38] sm:$0xff]  ;;  %v80_v19 = vand.u32 4294901760, %v51_v16  ;;  %v53_v21 = vld [vmem:[#allocation5 + $0x40] sm:$0xff]  ;;  %v54_v23 = vld [vmem:[#allocation5 + $0x48] sm:$0xff]  ;;  %v2499_v34 = vsub.f32 %v45_v2, %v62_v5 }
  0x2a   :  { %v2477_v12 = vpack.c.bf16 %v65_v6, %v62_v5  ;;  %v2480_v13 = vpack.c.bf16 %v71_v9, %v68_v8  ;;  %v83_v20 = vand.u32 4294901760, %v52_v17  ;;  %v2488_v22 = vld [vmem:[#allocation2] sm:$0xf]  ;;  %v55_v24 = vld [vmem:[#allocation5 + $0x50] sm:$0xff]  ;;  %v57_v26 = vld [vmem:[#allocation5 + $0x60] sm:$0xff]  ;;  %v86_v27 = vand.u32 4294901760, %v53_v21 }
  0x2b   :  { %v2486_v18 = vpack.c.bf16 %v77_v15, %v74_v14  ;;  %v56_v25 = vld [vmem:[#allocation5 + $0x58] sm:$0xff]  ;;  %v58_v28 = vld [vmem:[#allocation5 + $0x68] sm:$0xff]  ;;  %v59_v29 = vld [vmem:[#allocation5 + $0x70] sm:$0xff]  ;;  %v2494_v31 = vand.u32 4294901760, %v2488_v22  ;;  %v89_v33 = vand.u32 4294901760, %v54_v23  ;;  %v2501_v35 = vsub.f32 %v46_v3, %v65_v6  ;;  %s1379_s18 = sshll.u32 %s2414_s17, 4  ;;  %s1380_s18 = int_to_ptr.vmem [resolvable:$true] %s1379_s18 }
  0x2c   :  { %2017 = vmatpush3.bf16.msra.mxu0 %v2477_v12  ;;  %2161 = vmatpush3.bf16.msra.mxu1 %v2477_v12  ;;  %v60_v30 = vld [vmem:[#allocation5 + $0x78] sm:$0xff]  ;;  %v2497_v32 = vpack.c.bf16 %v83_v20, %v80_v19  ;;  %v92_v36 = vand.u32 4294901760, %v55_v24  ;;  %v95_v37 = vand.u32 4294901760, %v56_v25  ;;  %v98_v38 = vand.u32 4294901760, %v57_v26  ;;  %s2379_s19 = scalar_lea.vmem %s1380_s18, 64  ;;  %p2384_p3 = scmp.lt.s32.totalorder %s1380_s18, %s1380_s18 }
  0x2d   :  { %2018 = vmatprep.subr.bf16.mxu0 %v2411_v0  ;;  %2162 = vmatprep.subr.bf16.mxu1 %v2411_v0  ;;  %v101_v39 = vand.u32 4294901760, %v58_v28  ;;  %v104_v40 = vand.u32 4294901760, %v59_v29  ;;  %v107_v41 = vand.u32 4294901760, %v60_v30  ;;  %v2508_v42 = vsub.f32 %v2488_v22, %v2494_v31  ;;  %p2380_p2 = scmp.ne.s32.totalorder %s1380_s18, %s2379_s19  ;;  %p2385_p4 = scmp.lt.s32.totalorder %s2379_s19, %s2379_s19 }
  0x2e   :  { %v2510_v43 = vsub.f32 %v47_v4, %v68_v8  ;;  %v2513_v44 = vpack.c.bf16 %v89_v33, %v86_v27  ;;  %v155_v45 = vand.u32 4294901760, %v2499_v34  ;;  %v162_v46 = vand.u32 4294901760, %v2501_v35 }
  0x2f   :  { %v2517_v47 = vsub.f32 %v48_v7, %v71_v9  ;;  %v2521_v48 = vsub.f32 %v49_v10, %v74_v14  ;;  %v2524_v49 = vpack.c.bf16 %v95_v37, %v92_v36  ;;  %v2526_v50 = vpack.c.bf16 %v101_v39, %v98_v38  ;;  %p2386_p5 = por %p2385_p4, %p2384_p3 }
  0x30   :  { %2020 = vmatpush3.bf16.msra.mxu0 %v2480_v13  ;;  %2164 = vmatpush3.bf16.msra.mxu1 %v2480_v13  ;;  %v2528_v51 = vpack.c.bf16 %v107_v41, %v104_v40  ;;  %v144_v52 = vand.u32 4294901760, %v2508_v42  ;;  %v169_v53 = vand.u32 4294901760, %v2510_v43  ;;  %v2532_v54 = vsub.f32 %v50_v11, %v77_v15 }
  0x31   :  { %2021 = vmatprep.subr.bf16.mxu0 %v2411_v0  ;;  %2165 = vmatprep.subr.bf16.mxu1 %v2411_v0  ;;  %v2534_v55 = vsub.f32 %v51_v16, %v80_v19  ;;  %v156_v56 = vsub.f32 %v2499_v34, %v155_v45  ;;  %v163_v57 = vsub.f32 %v2501_v35, %v162_v46  ;;  %v176_v58 = vand.u32 4294901760, %v2517_v47  ;;  %p2387_p6 = pnand %p2386_p5, %p2380_p2 }
  0x32   :  { %v2540_v59 = vsub.f32 %v52_v17, %v83_v20  ;;  %v183_v60 = vand.u32 4294901760, %v2521_v48  ;;  %v2545_v61 = vsub.f32 %v53_v21, %v86_v27  ;;  %v2547_v62 = vsub.f32 %v54_v23, %v89_v33 }
  0x33   :  { %v2549_v63 = vsub.f32 %v55_v24, %v92_v36  ;;  %v2552_v2 = vsub.f32 %v56_v25, %v95_v37  ;;  %v2554_v3 = vsub.f32 %v57_v26, %v98_v38  ;;  %v2556_v4 = vsub.f32 %v58_v28, %v101_v39 }
  0x34   :  { %2023 = vmatpush3.bf16.msra.mxu0 %v2486_v18  ;;  %2167 = vmatpush3.bf16.msra.mxu1 %v2486_v18  ;;  %v2558_v5 = vsub.f32 %v59_v29, %v104_v40  ;;  %v145_v6 = vsub.f32 %v2508_v42, %v144_v52  ;;  %v170_v7 = vsub.f32 %v2510_v43, %v169_v53  ;;  %v190_v8 = vand.u32 4294901760, %v2532_v54 }
  0x35   :  { %2024 = vmatprep.subr.bf16.mxu0 %v2411_v0  ;;  %2168 = vmatprep.subr.bf16.mxu1 %v2411_v0  ;;  %v2565_v9 = vsub.f32 %v60_v30, %v107_v41  ;;  %v157_v10 = vand.u32 4294901760, %v156_v56  ;;  %v164_v11 = vand.u32 4294901760, %v163_v57  ;;  %v177_v14 = vsub.f32 %v2517_v47, %v176_v58 }
  0x36   :  { %v197_v15 = vand.u32 4294901760, %v2534_v55  ;;  %v204_v16 = vand.u32 4294901760, %v2540_v59  ;;  %v211_v17 = vand.u32 4294901760, %v2545_v61  ;;  %v218_v19 = vand.u32 4294901760, %v2547_v62 }
  0x37   :  { %v225_v20 = vand.u32 4294901760, %v2549_v63  ;;  %v232_v21 = vand.u32 4294901760, %v2552_v2  ;;  %v239_v23 = vand.u32 4294901760, %v2554_v3  ;;  %v246_v24 = vand.u32 4294901760, %v2556_v4 }
  0x38   :  { %2026 = vmatpush3.bf16.msra.mxu0 %v2497_v32  ;;  %2170 = vmatpush3.bf16.msra.mxu1 %v2497_v32  ;;  %v253_v25 = vand.u32 4294901760, %v2558_v5  ;;  %v260_v26 = vand.u32 4294901760, %v2565_v9  ;;  %v2582_v27 = vpack.c.bf16 %v162_v46, %v155_v45  ;;  %v2584_v28 = vpack.c.bf16 %v176_v58, %v169_v53 }
  0x39   :  { %2027 = vmatprep.subr.bf16.mxu0 %v2411_v0  ;;  %2171 = vmatprep.subr.bf16.mxu1 %v2411_v0  ;;  %v2586_v29 = vpack.c.bf16 %v190_v8, %v183_v60  ;;  %v2589_v30 = vpack.c.bf16 %v204_v16, %v197_v15  ;;  %v2591_v33 = vpack.c.bf16 %v218_v19, %v211_v17  ;;  %v146_v39 = vand.u32 4294901760, %v145_v6 }
  0x3a   :  { %v2593_v36 = vpack.c.bf16 %v232_v21, %v225_v20  ;;  %v2595_v37 = vpack.c.bf16 %v246_v24, %v239_v23  ;;  %v2598_v38 = vpack.c.bf16 %v260_v26, %v253_v25  ;;  %v184_v40 = vsub.f32 %v2521_v48, %v183_v60 }
  0x3b   :  { %v2604_v41 = vpack.c.bf16 %v164_v11, %v157_v10  ;;  %v171_v45 = vand.u32 4294901760, %v170_v7  ;;  %v178_v46 = vand.u32 4294901760, %v177_v14  ;;  %v191_v53 = vsub.f32 %v2532_v54, %v190_v8 }
  0x3c   :  { %2029 = vmatpush3.bf16.msra.mxu0 %v2513_v44  ;;  %2173 = vmatpush3.bf16.msra.mxu1 %v2513_v44  ;;  %v198_v56 = vsub.f32 %v2534_v55, %v197_v15  ;;  %v185_v58 = vand.u32 4294901760, %v184_v40  ;;  %v205_v6 = vsub.f32 %v2540_v59, %v204_v16  ;;  %v212_v11 = vsub.f32 %v2545_v61, %v211_v17 }
  0x3d   :  { %2030 = vmatprep.subr.bf16.mxu0 %v2411_v0  ;;  %2174 = vmatprep.subr.bf16.mxu1 %v2411_v0  ;;  %v2612_v57 = vpack.c.bf16 %v178_v46, %v171_v45  ;;  %v192_v60 = vand.u32 4294901760, %v191_v53  ;;  %v219_v14 = vsub.f32 %v2547_v62, %v218_v19  ;;  %v226_v15 = vsub.f32 %v2549_v63, %v225_v20 }
  0x3e   :  { %v199_v7 = vand.u32 4294901760, %v198_v56  ;;  %v206_v10 = vand.u32 4294901760, %v205_v6  ;;  %v233_v45 = vsub.f32 %v2552_v2, %v232_v21  ;;  %v240_v46 = vsub.f32 %v2554_v3, %v239_v23 }
  0x3f   :  { %v2619_v8 = vpack.c.bf16 %v192_v60, %v185_v58  ;;  %v220_v40 = vand.u32 4294901760, %v219_v14  ;;  %v227_v19 = vand.u32 4294901760, %v226_v15  ;;  %v247_v20 = vsub.f32 %v2556_v4, %v246_v24 }
  0x40   :  { %2032 = vmatpush3.bf16.msra.mxu0 %v2524_v49  ;;  %2176 = vmatpush3.bf16.msra.mxu1 %v2524_v49  ;;  %v2626_v16 = vpack.c.bf16 %v206_v10, %v199_v7  ;;  %v234_v53 = vand.u32 4294901760, %v233_v45  ;;  %v254_v56 = vsub.f32 %v2558_v5, %v253_v25  ;;  %v241_v21 = vand.u32 4294901760, %v240_v46 }
  0x41   :  { %2033 = vmatprep.subr.bf16.mxu0 %v2411_v0  ;;  %2177 = vmatprep.subr.bf16.mxu1 %v2411_v0  ;;  %v248_v60 = vand.u32 4294901760, %v247_v20  ;;  %v261_v23 = vsub.f32 %v2565_v9, %v260_v26  ;;  %v2653_v26 = vpack.c.bf16 %v2501_v35, %v2499_v34  ;;  %v2660_v10 = vpack.c.bf16 %v2517_v47, %v2510_v43 }
  0x42   :  { %v2638_v58 = vpack.c.bf16 %v234_v53, %v227_v19  ;;  %v255_v7 = vand.u32 4294901760, %v254_v56  ;;  %v2668_v34 = vpack.c.bf16 %v2532_v54, %v2521_v48  ;;  %v2674_v35 = vpack.c.bf16 %v2540_v59, %v2534_v55 }
  0x43   :  { %v2643_v6 = vpack.c.bf16 %v248_v60, %v241_v21  ;;  %v262_v24 = vand.u32 4294901760, %v261_v23  ;;  %v2680_v43 = vpack.c.bf16 %v2547_v62, %v2545_v61  ;;  %v2686_v47 = vpack.c.bf16 %v2552_v2, %v2549_v63 }
  0x44   :  { %2035 = vmatpush3.bf16.msra.mxu0 %v2526_v50  ;;  %2179 = vmatpush3.bf16.msra.mxu1 %v2526_v50  ;;  %v2692_v48 = vpack.c.bf16 %v2556_v4, %v2554_v3  ;;  %v2698_v54 = vpack.c.bf16 %v2565_v9, %v2558_v5 }
  0x45   :  { %2036 = vmatprep.subr.bf16.mxu0 %v2411_v0  ;;  %2180 = vmatprep.subr.bf16.mxu1 %v2411_v0  ;;  %v2647_v25 = vpack.c.bf16 %v262_v24, %v255_v7 }
  0x48   :  { %2038 = vmatpush3.bf16.msra.mxu0 %v2528_v51  ;;  %2182 = vmatpush3.bf16.msra.mxu1 %v2528_v51 }
  0x49   :  { %2039 = vmatprep.subr.bf16.mxu0 %v2411_v0  ;;  %2183 = vmatprep.subr.bf16.mxu1 %v2411_v0 }
  0x4b   :  { %1628 = vmatmul.mubr.f32.vlgmr.msra.gmra.mrb[0].mxu0 %v146_v39  ;;  %v213_v39 = vand.u32 4294901760, %v212_v11 }
  0x4c   :  { %2041 = vmatpush3.bf16.msra.mxu0 %v2604_v41  ;;  %1662 = vmatprep.mubr.msk.f32.mxu0 %vm2412_vm0, %v2413_v1 }
  0x4d   :  { %2042 = vmatprep.subr.bf16.mxu0 %v2411_v0  ;;  %v2632_v17 = vpack.c.bf16 %v220_v40, %v213_v39 }
  0x50   :  { %2044 = vmatpush3.bf16.msra.mxu0 %v2612_v57 }
  0x51   :  { %2045 = vmatprep.subr.bf16.mxu0 %v2411_v0 }
  0x54   :  { %2047 = vmatpush3.bf16.msra.mxu0 %v2619_v8 }
  0x55   :  { %2048 = vmatprep.subr.bf16.mxu0 %v2411_v0 }
  0x58   :  { %2050 = vmatpush3.bf16.msra.mxu0 %v2626_v16 }
  0x59   :  { %2051 = vmatprep.subr.bf16.mxu0 %v2411_v0 }
  0x5c   :  { %2053 = vmatpush3.bf16.msra.mxu0 %v2632_v17 }
  0x5d   :  { %2054 = vmatprep.subr.bf16.mxu0 %v2411_v0 }
  0x60   :  { %2056 = vmatpush3.bf16.msra.mxu0 %v2638_v58 }
  0x61   :  { %2057 = vmatprep.subr.bf16.mxu0 %v2411_v0 }
  0x64   :  { %2059 = vmatpush3.bf16.msra.mxu0 %v2643_v6 }
  0x65   :  { %2060 = vmatprep.subr.bf16.mxu0 %v2411_v0 }
  0x68   :  { %2062 = vmatpush3.bf16.msra.mxu0 %v2647_v25 }
  0x69   :  { %2063 = vmatprep.subr.bf16.mxu0 %v2411_v0 }
  0x6b   :  { %1663 = vmatmul.mubr.f32.vlgmr.msra.gmra.mrb[0].mxu0 %v2494_v31 }
  0x6c   :  { %2065 = vmatpush3.bf16.msra.mxu0 %v2653_v26  ;;  %1697 = vmatprep.mubr.msk.f32.mxu0 %vm2412_vm0, %v2413_v1 }
  0x6d   :  { %2066 = vmatprep.subr.bf16.mxu0 %v2411_v0 }
  0x70   :  { %2068 = vmatpush3.bf16.msra.mxu0 %v2660_v10 }
  0x71   :  { %2069 = vmatprep.subr.bf16.mxu0 %v2411_v0 }
  0x74   :  { %2071 = vmatpush3.bf16.msra.mxu0 %v2668_v34 }
  0x75   :  { %2072 = vmatprep.subr.bf16.mxu0 %v2411_v0 }
  0x78   :  { %2074 = vmatpush3.bf16.msra.mxu0 %v2674_v35 }
  0x79   :  { %2075 = vmatprep.subr.bf16.mxu0 %v2411_v0 }
  0x7c   :  { %2077 = vmatpush3.bf16.msra.mxu0 %v2680_v43 }
  0x7d   :  { %2078 = vmatprep.subr.bf16.mxu0 %v2411_v0 }
  0x80   :  { %2080 = vmatpush3.bf16.msra.mxu0 %v2686_v47 }
  0x81   :  { %2081 = vmatprep.subr.bf16.mxu0 %v2411_v0 }
  0x84   :  { %2083 = vmatpush3.bf16.msra.mxu0 %v2692_v48 }
  0x85   :  { %2084 = vmatprep.subr.bf16.mxu0 %v2411_v0 }
  0x88   :  { %2086 = vmatpush3.bf16.msra.mxu0 %v2698_v54 }
  0x89   :  { %2087 = vmatprep.subr.bf16.mxu0 %v2411_v0 }
  0x8b   :  { %1698 = vmatmul.mubr.f32.vlgmr.msra.gmra.mrb[0].mxu0 %v2508_v42 }
  0x8c   :  { %2089 = vmatpush3.bf16.msra.mxu0 %v2477_v12  ;;  %1732 = vmatprep.mubr.msk.f32.mxu0 %vm2412_vm0, %v2413_v1 }
  0x8d   :  { %2090 = vmatprep.subr.bf16.mxu0 %v2411_v0 }
  0x90   :  { %2092 = vmatpush3.bf16.msra.mxu0 %v2480_v13 }
  0x91   :  { %2093 = vmatprep.subr.bf16.mxu0 %v2411_v0 }
  0x94   :  { %2095 = vmatpush3.bf16.msra.mxu0 %v2486_v18 }
  0x95   :  { %2096 = vmatprep.subr.bf16.mxu0 %v2411_v0 }
  0x98   :  { %2098 = vmatpush3.bf16.msra.mxu0 %v2497_v32 }
  0x99   :  { %2099 = vmatprep.subr.bf16.mxu0 %v2411_v0 }
  0x9c   :  { %2101 = vmatpush3.bf16.msra.mxu0 %v2513_v44 }
  0x9d   :  { %2102 = vmatprep.subr.bf16.mxu0 %v2411_v0 }
  0xa0   :  { %2104 = vmatpush3.bf16.msra.mxu0 %v2524_v49 }
  0xa1   :  { %2105 = vmatprep.subr.bf16.mxu0 %v2411_v0 }
  0xa4   :  { %2107 = vmatpush3.bf16.msra.mxu0 %v2526_v50 }
  0xa5   :  { %2108 = vmatprep.subr.bf16.mxu0 %v2411_v0 }
  0xa8   :  { %2110 = vmatpush3.bf16.msra.mxu0 %v2528_v51 }
  0xa9   :  { %2111 = vmatprep.subr.bf16.mxu0 %v2411_v0 }
  0xab   :  { %1733 = vmatmul.mubr.f32.vlgmr.msra.gmra.mrb[0].mxu0 %v144_v52 }
  0xac   :  { %2113 = vmatpush3.bf16.msra.mxu0 %v2582_v27  ;;  %1767 = vmatprep.mubr.msk.f32.mxu0 %vm2412_vm0, %v2413_v1 }
  0xad   :  { %2114 = vmatprep.subr.bf16.mxu0 %v2411_v0 }
  0xb0   :  { %2116 = vmatpush3.bf16.msra.mxu0 %v2584_v28 }
  0xb1   :  { %2117 = vmatprep.subr.bf16.mxu0 %v2411_v0 }
  0xb4   :  { %2119 = vmatpush3.bf16.msra.mxu0 %v2586_v29 }
  0xb5   :  { %2120 = vmatprep.subr.bf16.mxu0 %v2411_v0 }
  0xb8   :  { %2122 = vmatpush3.bf16.msra.mxu0 %v2589_v30 }
  0xb9   :  { %2123 = vmatprep.subr.bf16.mxu0 %v2411_v0 }
  0xbc   :  { %2125 = vmatpush3.bf16.msra.mxu0 %v2591_v33 }
  0xbd   :  { %2126 = vmatprep.subr.bf16.mxu0 %v2411_v0 }
  0xc0   :  { %2128 = vmatpush3.bf16.msra.mxu0 %v2593_v36 }
  0xc1   :  { %2129 = vmatprep.subr.bf16.mxu0 %v2411_v0 }
  0xc4   :  { %2131 = vmatpush3.bf16.msra.mxu0 %v2595_v37 }
  0xc5   :  { %2132 = vmatprep.subr.bf16.mxu0 %v2411_v0 }
  0xc8   :  { %2134 = vmatpush3.bf16.msra.mxu0 %v2598_v38 }
  0xc9   :  { %2135 = vmatprep.subr.bf16.mxu0 %v2411_v0 }
  0xcb   :  { %1768 = vmatmul.mubr.f32.vlgmr.msra.gmra.mrb[0].mxu0 %v2494_v31 }
  0xcc   :  { %2137 = vmatpush3.bf16.msra.mxu0 %v2477_v12  ;;  %1802 = vmatprep.mubr.msk.f32.mxu0 %vm2412_vm0, %v2413_v1 }
  0xcd   :  { %2138 = vmatprep.subr.bf16.mxu0 %v2411_v0 }
  0xd0   :  { %2140 = vmatpush3.bf16.msra.mxu0 %v2480_v13 }
  0xd1   :  { %2141 = vmatprep.subr.bf16.mxu0 %v2411_v0 }
  0xd4   :  { %2143 = vmatpush3.bf16.msra.mxu0 %v2486_v18 }
  0xd5   :  { %2144 = vmatprep.subr.bf16.mxu0 %v2411_v0 }
  0xd8   :  { %2146 = vmatpush3.bf16.msra.mxu0 %v2497_v32 }
  0xd9   :  { %2147 = vmatprep.subr.bf16.mxu0 %v2411_v0 }
  0xdc   :  { %2149 = vmatpush3.bf16.msra.mxu0 %v2513_v44 }
  0xdd   :  { %2150 = vmatprep.subr.bf16.mxu0 %v2411_v0 }
  0xe0   :  { %2152 = vmatpush3.bf16.msra.mxu0 %v2524_v49 }
  0xe1   :  { %2153 = vmatprep.subr.bf16.mxu0 %v2411_v0 }
  0xe4   :  { %2155 = vmatpush3.bf16.msra.mxu0 %v2526_v50 }
  0xe5   :  { %2156 = vmatprep.subr.bf16.mxu0 %v2411_v0 }
  0xe8   :  { %2158 = vmatpush3.bf16.msra.mxu0 %v2528_v51 }
  0xeb   :  { %1803 = vmatmul.mubr.f32.vlgmr.msra.gmra.mrb[0].mxu0 %v2494_v31 }
 0x1be   :  { %v698_v42 = vpop.f32.mrb[0].mxu0 }
 0x1bf   :  { %v2762_v52 = vsub.f32 %v2488_v22, %v698_v42  ;;  %v1804_v55 = vpop.f32.mrb[1].mxu0 }
 0x1c1   :  { %v703_v59 = vmul.f32 %v2762_v52, %v2762_v52 }
 0x1c3   :  { %v2766_v61 = vand.u32 4294901760, %v703_v59 }
 0x1c5   :  { %v786_v62 = vsub.f32 %v703_v59, %v2766_v61 }
 0x1c7   :  { %v787_v63 = vand.u32 4294901760, %v786_v62 }
 0x1c9   :  { %v788_v2 = vsub.f32 %v786_v62, %v787_v63 }
 0x1cb   :  { %v789_v3 = vand.u32 4294901760, %v788_v2 }
 0x1cd   :  { %1838 = vmatmul.mubr.f32.vlgmr.msra.gmra.mrb[0].mxu1 %v789_v3 }
 0x1ce   :  { %2185 = vmatpush3.bf16.msra.mxu1 %v2604_v41  ;;  %1872 = vmatprep.mubr.msk.f32.mxu1 %vm2412_vm0, %v2413_v1 }
 0x1cf   :  { %2186 = vmatprep.subr.bf16.mxu1 %v2411_v0 }
 0x1d2   :  { %2188 = vmatpush3.bf16.msra.mxu1 %v2612_v57 }
 0x1d3   :  { %2189 = vmatprep.subr.bf16.mxu1 %v2411_v0 }
 0x1d6   :  { %2191 = vmatpush3.bf16.msra.mxu1 %v2619_v8 }
 0x1d7   :  { %2192 = vmatprep.subr.bf16.mxu1 %v2411_v0 }
 0x1da   :  { %2194 = vmatpush3.bf16.msra.mxu1 %v2626_v16 }
 0x1db   :  { %2195 = vmatprep.subr.bf16.mxu1 %v2411_v0 }
 0x1de   :  { %2197 = vmatpush3.bf16.msra.mxu1 %v2632_v17 }
 0x1df   :  { %2198 = vmatprep.subr.bf16.mxu1 %v2411_v0 }
 0x1e2   :  { %2200 = vmatpush3.bf16.msra.mxu1 %v2638_v58 }
 0x1e3   :  { %2201 = vmatprep.subr.bf16.mxu1 %v2411_v0 }
 0x1e6   :  { %2203 = vmatpush3.bf16.msra.mxu1 %v2643_v6 }
 0x1e7   :  { %2204 = vmatprep.subr.bf16.mxu1 %v2411_v0 }
 0x1ea   :  { %2206 = vmatpush3.bf16.msra.mxu1 %v2647_v25 }
 0x1eb   :  { %2207 = vmatprep.subr.bf16.mxu1 %v2411_v0 }
 0x1ed   :  { %1873 = vmatmul.mubr.f32.vlgmr.msra.gmra.mrb[0].mxu1 %v2766_v61 }
 0x1ee   :  { %2209 = vmatpush3.bf16.msra.mxu1 %v2653_v26  ;;  %1907 = vmatprep.mubr.msk.f32.mxu1 %vm2412_vm0, %v2413_v1 }
 0x1ef   :  { %2210 = vmatprep.subr.bf16.mxu1 %v2411_v0 }
 0x1f2   :  { %2212 = vmatpush3.bf16.msra.mxu1 %v2660_v10 }
 0x1f3   :  { %2213 = vmatprep.subr.bf16.mxu1 %v2411_v0 }
 0x1f6   :  { %2215 = vmatpush3.bf16.msra.mxu1 %v2668_v34 }
 0x1f7   :  { %2216 = vmatprep.subr.bf16.mxu1 %v2411_v0 }
 0x1fa   :  { %2218 = vmatpush3.bf16.msra.mxu1 %v2674_v35 }
 0x1fb   :  { %2219 = vmatprep.subr.bf16.mxu1 %v2411_v0 }
 0x1fe   :  { %2221 = vmatpush3.bf16.msra.mxu1 %v2680_v43 }
 0x1ff   :  { %2222 = vmatprep.subr.bf16.mxu1 %v2411_v0 }
 0x202   :  { %2224 = vmatpush3.bf16.msra.mxu1 %v2686_v47 }
 0x203   :  { %2225 = vmatprep.subr.bf16.mxu1 %v2411_v0 }
 0x206   :  { %2227 = vmatpush3.bf16.msra.mxu1 %v2692_v48 }
 0x207   :  { %2228 = vmatprep.subr.bf16.mxu1 %v2411_v0 }
 0x20a   :  { %2230 = vmatpush3.bf16.msra.mxu1 %v2698_v54 }
 0x20b   :  { %2231 = vmatprep.subr.bf16.mxu1 %v2411_v0 }
 0x20d   :  { %1908 = vmatmul.mubr.f32.vlgmr.msra.gmra.mrb[0].mxu1 %v786_v62 }
 0x20e   :  { %2233 = vmatpush3.bf16.msra.mxu1 %v2477_v12  ;;  %1942 = vmatprep.mubr.msk.f32.mxu1 %vm2412_vm0, %v2413_v1 }
 0x20f   :  { %2234 = vmatprep.subr.bf16.mxu1 %v2411_v0 }
 0x212   :  { %2236 = vmatpush3.bf16.msra.mxu1 %v2480_v13 }
 0x213   :  { %2237 = vmatprep.subr.bf16.mxu1 %v2411_v0 }
 0x216   :  { %2239 = vmatpush3.bf16.msra.mxu1 %v2486_v18 }
 0x217   :  { %2240 = vmatprep.subr.bf16.mxu1 %v2411_v0 }
 0x21a   :  { %2242 = vmatpush3.bf16.msra.mxu1 %v2497_v32 }
 0x21b   :  { %2243 = vmatprep.subr.bf16.mxu1 %v2411_v0 }
 0x21e   :  { %2245 = vmatpush3.bf16.msra.mxu1 %v2513_v44 }
 0x21f   :  { %2246 = vmatprep.subr.bf16.mxu1 %v2411_v0 }
 0x222   :  { %2248 = vmatpush3.bf16.msra.mxu1 %v2524_v49 }
 0x223   :  { %2249 = vmatprep.subr.bf16.mxu1 %v2411_v0 }
 0x226   :  { %2251 = vmatpush3.bf16.msra.mxu1 %v2526_v50 }
 0x227   :  { %2252 = vmatprep.subr.bf16.mxu1 %v2411_v0 }
 0x22a   :  { %2254 = vmatpush3.bf16.msra.mxu1 %v2528_v51 }
 0x22b   :  { %2255 = vmatprep.subr.bf16.mxu1 %v2411_v0 }
 0x22d   :  { %1943 = vmatmul.mubr.f32.vlgmr.msra.gmra.mrb[0].mxu1 %v787_v63 }
 0x22e   :  { %2257 = vmatpush3.bf16.msra.mxu1 %v2582_v27  ;;  %1977 = vmatprep.mubr.msk.f32.mxu1 %vm2412_vm0, %v2413_v1 }
 0x22f   :  { %2258 = vmatprep.subr.bf16.mxu1 %v2411_v0 }
 0x232   :  { %2260 = vmatpush3.bf16.msra.mxu1 %v2584_v28 }
 0x233   :  { %2261 = vmatprep.subr.bf16.mxu1 %v2411_v0 }
 0x236   :  { %2263 = vmatpush3.bf16.msra.mxu1 %v2586_v29 }
 0x237   :  { %2264 = vmatprep.subr.bf16.mxu1 %v2411_v0 }
 0x23a   :  { %2266 = vmatpush3.bf16.msra.mxu1 %v2589_v30 }
 0x23b   :  { %2267 = vmatprep.subr.bf16.mxu1 %v2411_v0 }
 0x23e   :  { %2269 = vmatpush3.bf16.msra.mxu1 %v2591_v33 }
 0x23f   :  { %2270 = vmatprep.subr.bf16.mxu1 %v2411_v0 }
 0x242   :  { %2272 = vmatpush3.bf16.msra.mxu1 %v2593_v36 }
 0x243   :  { %2273 = vmatprep.subr.bf16.mxu1 %v2411_v0 }
 0x246   :  { %2275 = vmatpush3.bf16.msra.mxu1 %v2595_v37 }
 0x247   :  { %2276 = vmatprep.subr.bf16.mxu1 %v2411_v0 }
 0x24a   :  { %2278 = vmatpush3.bf16.msra.mxu1 %v2598_v38 }
 0x24b   :  { %2279 = vmatprep.subr.bf16.mxu1 %v2411_v0 }
 0x24d   :  { %1978 = vmatmul.mubr.f32.vlgmr.msra.gmra.mrb[0].mxu1 %v2766_v61 }
 0x24e   :  { %2281 = vmatpush3.bf16.msra.mxu1 %v2477_v12  ;;  %2012 = vmatprep.mubr.msk.f32.mxu1 %vm2412_vm0, %v2413_v1 }
 0x24f   :  { %2282 = vmatprep.subr.bf16.mxu1 %v2411_v0 }
 0x252   :  { %2284 = vmatpush3.bf16.msra.mxu1 %v2480_v13 }
 0x253   :  { %2285 = vmatprep.subr.bf16.mxu1 %v2411_v0 }
 0x256   :  { %2287 = vmatpush3.bf16.msra.mxu1 %v2486_v18 }
 0x257   :  { %2288 = vmatprep.subr.bf16.mxu1 %v2411_v0 }
 0x25a   :  { %2290 = vmatpush3.bf16.msra.mxu1 %v2497_v32 }
 0x25b   :  { %2291 = vmatprep.subr.bf16.mxu1 %v2411_v0 }
 0x25e   :  { %2293 = vmatpush3.bf16.msra.mxu1 %v2513_v44 }
 0x25f   :  { %2294 = vmatprep.subr.bf16.mxu1 %v2411_v0 }
 0x262   :  { %2296 = vmatpush3.bf16.msra.mxu1 %v2524_v49 }
 0x263   :  { %2297 = vmatprep.subr.bf16.mxu1 %v2411_v0 }
 0x266   :  { %2299 = vmatpush3.bf16.msra.mxu1 %v2526_v50 }
 0x267   :  { %2300 = vmatprep.subr.bf16.mxu1 %v2411_v0  ;;  %v1389_v0 = vld [vmem:[%s2882_s2] ss:$0 sm:$0xff] }
 0x26a   :  { %2302 = vmatpush3.bf16.msra.mxu1 %v2528_v51  ;;  %v1390_v51 = vld [vmem:[%s2883_s3] ss:$0 sm:$0xff] }
 0x26d   :  { %2013 = vmatmul.mubr.f32.vlgmr.msra.gmra.mrb[0].mxu1 %v2766_v61 }
 0x340   :  { %v1341_v1 = vpop.f32.mrb[0].mxu1 }
 0x341   :  { %2331 = vrsqrt.f32 %v1341_v1  ;;  %v2014_v12 = vpop.f32.mrb[1].mxu1  ;;  %vm1347_vm1 = vcmp.eq.f32.partialorder %v1341_v1, inf  ;;  %v1350_v22 = vand.u32 2147483648, %v1341_v1  ;;  %vm1349_vm2 = vcmp.eq.f32.partialorder %v1341_v1, 0.0 }
 0x34b   :  { %v2332_v13 = vpop.eup %2331 }
 0x34c   :  { %v1346_v18 = vmul.f32 %v2332_v13, %v1341_v1 }
 0x34e   :  { %v1348_v31 = vsel %vm1347_vm1, %v1341_v1, %v1346_v18 }
 0x34f   :  { %v1351_v32 = vsel %vm1349_vm2, %v1350_v22, %v1348_v31 }
 0x350   :  { %v1352_v44 = vadd.f32 1e-10, %v1351_v32 }
 0x352   :  { %2333 = vrcp.f32 %v1352_v44 }
 0x35c   :  { %v2334_v49 = vpop.eup %2333 }
 0x35d   :  { %v1355_v50 = vmul.f32 %v2334_v49, %v2762_v52 }
 0x35f   :  { %v1363_v4 = vmul.f32 %v1389_v0, %v1355_v50 }
 0x361   :  { %v1371_v5 = vadd.f32 %v1390_v51, %v1363_v4 }
 0x363   :  { %1372 = vst [vmem:[#allocation7] sm:$0xf] %v1371_v5 }
 0x364   :  { %2390 = shalt.err (!%p2387_p6)
}
 0x365   :  { %s2391_s21 = scalar_lea.hbm %s2884_s4, 64 }
 0x366   :  { %p2392_p7 = scmp.ne.s32.totalorder %s2884_s4, %s2391_s21  ;;  %p2395_p8 = scmp.lt.u32.totalorder %s2391_s21, %s2884_s4 }
 0x368   :  { %p2397_p9 = pnand %p2395_p8, %p2392_p7 }
 0x36a   :  { %2400 = shalt.err (!%p2397_p9)
}
 0x36b   :  { %1382 = dma.vmem_to_hbm [thread:$0]  %s1380_s18, 64, %s2884_s4, [#allocation4]  }
 0x36c   :  { %2405 = dma.done.wait [#allocation4], 64  }
 0x36d   :  { %2406 = vsyncadd [#allocation4], 4294967232 }
 0x36e   :  { %1386 = vsyncpa [#allocation3], 1 }
 0x36f   :  { %1387 = vsyncpa [#allocation6], 1 }
 0x370   :  { %1388 = vsyncpa [#allocation4], 1 }

</bundles_post_ra>
